<compile_context>
chip_gen: v5e
topology: v5e:2x2
jax: 0.10.0
libtpu: 0.0.40
codegen_flags: <defaults>
</compile_context>

<pallas_src>
import math

import jax
import jax.numpy as jnp
from jax.experimental import pallas as pl
from jax.experimental.pallas import tpu as pltpu


def _ctf_apply_kernel(pars_ref, grid_ref, x_ref, o_ref):
    """One grid step = TB particles x TS spatial pixels.

    pars_ref: VMEM (TB, 1, 8) f32  fused per-particle constants
              [b0, bc, bs, b4, phi, 0, 0, 0]
    grid_ref: VMEM (4, TS)    f32  px-independent grid terms (pixel units):
              [x^2-y^2, 2xy, |b|^2, |b|^4]
    x_ref:    VMEM (TB, C, TS) f32  Fourier image (real/imag channels)
    o_ref:    VMEM (TB, C, TS) f32  CTF * Fourier image
    """
    g = grid_ref[...]                 # (4, TS)
    c2f2 = g[0:1, :]                  # cos(2*theta) * f^2   (pixel units)
    s2f2 = g[1:2, :]                  # sin(2*theta) * f^2
    f2 = g[2:3, :]
    f4 = g[3:4, :]

    p = pars_ref[...][:, 0, :]        # (TB, 8)
    b0 = p[:, 0:1]                    # (TB, 1)
    bc = p[:, 1:2]
    bs = p[:, 2:3]
    b4 = p[:, 3:4]
    phi = p[:, 4:5]

    # gamma = K1*defocus(theta)*f^2 + K2*f^4 with all px/defocus/lambda/Cs
    # scalars folded into b0/bc/bs/b4 (wrapper).
    gamma = b0 * f2 + bc * c2f2 + bs * s2f2 + b4 * f4 + phi     # (TB, TS)
    ctf = -jnp.sin(gamma)             # single EUP transcendental per element
    o_ref[...] = x_ref[...] * ctf[:, None, :]


def _pick_spatial_tile(ss, c, target_bytes=2 << 20):
    """Largest lane-aligned (x128) divisor of ss whose C*ts*4 stays <= target.
    Falls back to the full spatial extent (always a legal block)."""
    if ss * c * 4 <= target_bytes or ss % 128 != 0:
        return ss
    ts = max(128, min((target_bytes // (c * 4)) // 128 * 128, ss))
    while ss % ts:
        ts -= 128
    return ts


def _pick_particles_per_block(batch, bytes_per_particle, target_bytes=1 << 20):
    """Largest divisor of `batch` whose per-step traffic stays <= target_bytes."""
    tb = int(max(1, min(batch, target_bytes // max(bytes_per_particle, 1))))
    while batch % tb:
        tb -= 1
    return tb


def apply_ctf_pallas(x_fourier, ctf_params):
    """x_fourier: [B, C, S, S] f32; ctf_params: [B, 8] f32 raw CTF parameters
    [defocusU, defocusV, cos(2a), sin(2a), lambda, Cs, w(amp contrast), pixel_size].
    Returns CTF * x_fourier with the same shape/dtype."""
    B, C, S, S2 = x_fourier.shape
    assert S == S2
    SS = S * S

    # ---- per-particle scalar algebra hoisted out of the kernel ----
    d_u, d_v, c2a, s2a, lam, cs, w, px = [ctf_params[:, i] for i in range(8)]
    mean_def = 0.5 * (d_u + d_v)
    half_dd = 0.5 * (d_u - d_v)
    k1 = -math.pi * lam                               # coeff of defocus*f^2
    k2 = 0.5 * math.pi * cs * lam * lam * lam         # coeff of f^4
    inv2 = 1.0 / (jnp.float32(S) * px) ** 2           # (cycles/A)^2 per pixel^2
    b0 = k1 * mean_def * inv2
    bc = k1 * half_dd * c2a * inv2
    bs = k1 * half_dd * s2a * inv2
    b4 = k2 * inv2 * inv2
    phi = jnp.arcsin(w)                               # sin(phi)=w, cos(phi)=sqrt(1-w^2)
    zeros = jnp.zeros_like(b0)
    pars = jnp.stack([b0, bc, bs, b4, phi, zeros, zeros, zeros], axis=-1)
    pars = pars.astype(jnp.float32).reshape(B, 1, 8)

    # ---- px-independent frequency-grid terms (pixel units), computed once ----
    coords = jnp.arange(S, dtype=jnp.float32) - float(S // 2)
    by = coords[:, None]
    bx = coords[None, :]
    bf2 = bx * bx + by * by
    c2f2 = bx * bx - by * by                          # cos(2*theta) * f^2
    s2f2 = 2.0 * bx * by                              # sin(2*theta) * f^2
    grid_terms = jnp.stack([c2f2, s2f2, bf2, bf2 * bf2], axis=0)
    grid_terms = grid_terms.reshape(4, SS).astype(jnp.float32)

    # Lane-dense image layout: last dim S*S (multiple of 128 for S >= 16 pow2;
    # full-extent blocks are always legal regardless).
    x_flat = x_fourier.reshape(B, C, SS)

    # Spatial tile (lane axis) + particles per step so each block stays small
    # enough for scoped VMEM yet big enough to amortize per-step overhead.
    ts = _pick_spatial_tile(SS, C)
    tb = _pick_particles_per_block(B, 2 * C * ts * 4)

    out = pl.pallas_call(
        _ctf_apply_kernel,
        out_shape=jax.ShapeDtypeStruct((B, C, SS), x_fourier.dtype),
        grid_spec=pltpu.PrefetchScalarGridSpec(
            num_scalar_prefetch=0,
            grid=(B // tb, SS // ts),
            in_specs=[
                pl.BlockSpec((tb, 1, 8), lambda g, s: (g, 0, 0)),   # resident across s
                pl.BlockSpec((4, ts), lambda g, s: (0, s)),
                pl.BlockSpec((tb, C, ts), lambda g, s: (g, 0, s)),
            ],
            out_specs=pl.BlockSpec((tb, C, ts), lambda g, s: (g, 0, s)),
        ),
        compiler_params=pltpu.CompilerParams(
            dimension_semantics=("parallel", "parallel")),
    )(pars, grid_terms, x_flat)
    return out.reshape(B, C, S, S)


class CTFBase:
    """JAX/Pallas port of utils/ctf.py::CTFBase."""

    def __init__(self, resolution, num_particles, requires_grad=False):
        self.resolution = resolution
        self.num_particles = num_particles
        self.requires_grad = requires_grad

        # Deterministic synthetic per-particle CTF parameters (no checkpoint load).
        d_u = 10000.0 + 1000.0 * jnp.arange(num_particles, dtype=jnp.float32)  # Angstrom
        d_v = 9500.0 + 800.0 * jnp.arange(num_particles, dtype=jnp.float32)    # Angstrom
        angle = 0.3 - 0.5 * jnp.arange(num_particles, dtype=jnp.float32)       # rad
        lam = jnp.full((num_particles,), 0.019866, jnp.float32)                # 300 kV, Angstrom
        cs = jnp.full((num_particles,), 2.7e7, jnp.float32)                    # 2.7 mm in Angstrom
        w = jnp.full((num_particles,), 0.1, jnp.float32)                       # amplitude contrast
        px = jnp.full((num_particles,), 1.0, jnp.float32)                      # pixel size, Angstrom

        self.ctf_params = jnp.stack(
            [d_u, d_v, jnp.cos(2.0 * angle), jnp.sin(2.0 * angle), lam, cs, w, px],
            axis=-1,
        )  # [num_particles, 8]

    def forward(self, x_fourier, idcs=None, ctf_params=None, mode="gt",
                frequency_marcher=None):
        if idcs is None:
            idcs = jnp.arange(x_fourier.shape[0], dtype=jnp.int32)
        params = self.ctf_params[idcs]
        return apply_ctf_pallas(x_fourier, params)

    __call__ = forward


def _reference_jax(x_fourier, params):
    """Pure-JAX reference (original two-transcendental formulation)."""
    B, C, S, _ = x_fourier.shape
    d_u, d_v, c2a, s2a, lam, cs, w, px = [params[:, i] for i in range(8)]
    coords = jnp.arange(S, dtype=jnp.float32) - (S // 2)
    fy = coords[:, None][None] / (S * px[:, None, None])
    fx = coords[None, :][None] / (S * px[:, None, None])
    f2 = fx * fx + fy * fy
    f4 = f2 * f2
    denom = jnp.where(f2 > 0.0, f2, 1.0)
    cos2t = (fx * fx - fy * fy) / denom
    sin2t = 2.0 * fx * fy / denom
    defocus = (0.5 * (d_u + d_v)[:, None, None]
               + 0.5 * (d_u - d_v)[:, None, None]
               * (cos2t * c2a[:, None, None] + sin2t * s2a[:, None, None]))
    lam_b = lam[:, None, None]
    gamma = 2.0 * math.pi * (-0.5 * defocus * lam_b * f2
                             + 0.25 * cs[:, None, None] * lam_b ** 3 * f4)
    w_b = w[:, None, None]
    ctf = -jnp.sqrt(jnp.maximum(1.0 - w_b * w_b, 0.0)) * jnp.sin(gamma) - w_b * jnp.cos(gamma)
    return x_fourier * ctf[:, None, :, :]


if __name__ == "__main__":
    batch = 2
    resolution = 16
    channels = 2  # real / imag parts of the Fourier image

    key = jax.random.PRNGKey(0)
    x_fourier = jax.random.normal(key, (batch, channels, resolution, resolution),
                                  dtype=jnp.float32)

    ctf = CTFBase(resolution=resolution, num_particles=batch, requires_grad=False)

    out = ctf(x_fourier, idcs=jnp.arange(batch, dtype=jnp.int32))
    out = jax.block_until_ready(out)

    ref = _reference_jax(x_fourier, ctf.ctf_params)
    assert out.shape == x_fourier.shape and out.dtype == x_fourier.dtype
    # gamma reaches ~3e2 rad in f32; reassociated constants + single-sin phase
    # trick differ from the reference by a few 1e-4 at worst -> tolerance 2e-3.
    assert jnp.allclose(out, ref, atol=2e-3, rtol=2e-3)

    print("KERNEL_OK")
</pallas_src>

<mosaic_0001>
module attributes {stable_mosaic.version = 11 : i64} {
  func.func @_ctf_apply_kernel(%arg0: i32, %arg1: i32, %arg2: memref<2x1x8xf32, #tpu.memory_space<vmem>>, %arg3: memref<4x256xf32, #tpu.memory_space<vmem>>, %arg4: memref<2x2x256xf32, #tpu.memory_space<vmem>>, %arg5: memref<2x2x256xf32, #tpu.memory_space<vmem>>) attributes {dimension_semantics = [#tpu.dimension_semantics<parallel>, #tpu.dimension_semantics<parallel>], iteration_bounds = array<i64: 1, 1>, scalar_prefetch = 0 : i64, scratch_operands = 0 : i64, tpu.core_type = #tpu.core_type<tc>, window_params = [{transform_indices = @transform_0, window_bounds = array<i64: 2, 1, 8>}, {transform_indices = @transform_1, window_bounds = array<i64: 4, 256>}, {transform_indices = @transform_2, window_bounds = array<i64: 2, 2, 256>}, {transform_indices = @transform_3, window_bounds = array<i64: 2, 2, 256>}]} {
    %c0 = arith.constant 0 : index
    %c0_0 = arith.constant 0 : index
    %0 = vector.load %arg3[%c0, %c0_0] : memref<4x256xf32, #tpu.memory_space<vmem>>, vector<4x256xf32>
    %1 = vector.extract_strided_slice %0 {offsets = [0, 0], sizes = [1, 256], strides = [1, 1]} : vector<4x256xf32> to vector<1x256xf32>
    %2 = vector.extract_strided_slice %0 {offsets = [1, 0], sizes = [1, 256], strides = [1, 1]} : vector<4x256xf32> to vector<1x256xf32>
    %3 = vector.extract_strided_slice %0 {offsets = [2, 0], sizes = [1, 256], strides = [1, 1]} : vector<4x256xf32> to vector<1x256xf32>
    %4 = vector.extract_strided_slice %0 {offsets = [3, 0], sizes = [1, 256], strides = [1, 1]} : vector<4x256xf32> to vector<1x256xf32>
    %c0_1 = arith.constant 0 : index
    %c0_2 = arith.constant 0 : index
    %c0_3 = arith.constant 0 : index
    %5 = vector.load %arg2[%c0_1, %c0_2, %c0_3] : memref<2x1x8xf32, #tpu.memory_space<vmem>>, vector<2x1x8xf32>
    %6 = vector.shape_cast %5 : vector<2x1x8xf32> to vector<2x8xf32>
    %7 = vector.extract_strided_slice %6 {offsets = [0, 0], sizes = [2, 1], strides = [1, 1]} : vector<2x8xf32> to vector<2x1xf32>
    %8 = vector.extract_strided_slice %6 {offsets = [0, 1], sizes = [2, 1], strides = [1, 1]} : vector<2x8xf32> to vector<2x1xf32>
    %9 = vector.extract_strided_slice %6 {offsets = [0, 2], sizes = [2, 1], strides = [1, 1]} : vector<2x8xf32> to vector<2x1xf32>
    %10 = vector.extract_strided_slice %6 {offsets = [0, 3], sizes = [2, 1], strides = [1, 1]} : vector<2x8xf32> to vector<2x1xf32>
    %11 = vector.extract_strided_slice %6 {offsets = [0, 4], sizes = [2, 1], strides = [1, 1]} : vector<2x8xf32> to vector<2x1xf32>
    %12 = vector.broadcast %7 : vector<2x1xf32> to vector<2x256xf32>
    %13 = vector.broadcast %3 : vector<1x256xf32> to vector<2x256xf32>
    %14 = arith.mulf %12, %13 : vector<2x256xf32>
    %15 = vector.broadcast %8 : vector<2x1xf32> to vector<2x256xf32>
    %16 = vector.broadcast %1 : vector<1x256xf32> to vector<2x256xf32>
    %17 = arith.mulf %15, %16 : vector<2x256xf32>
    %18 = arith.addf %14, %17 : vector<2x256xf32>
    %19 = vector.broadcast %9 : vector<2x1xf32> to vector<2x256xf32>
    %20 = vector.broadcast %2 : vector<1x256xf32> to vector<2x256xf32>
    %21 = arith.mulf %19, %20 : vector<2x256xf32>
    %22 = arith.addf %18, %21 : vector<2x256xf32>
    %23 = vector.broadcast %10 : vector<2x1xf32> to vector<2x256xf32>
    %24 = vector.broadcast %4 : vector<1x256xf32> to vector<2x256xf32>
    %25 = arith.mulf %23, %24 : vector<2x256xf32>
    %26 = arith.addf %22, %25 : vector<2x256xf32>
    %27 = vector.broadcast %11 : vector<2x1xf32> to vector<2x256xf32>
    %28 = arith.addf %26, %27 : vector<2x256xf32>
    %29 = math.sin %28 : vector<2x256xf32>
    %cst = arith.constant 0.000000e+00 : f32
    %30 = vector.broadcast %cst : f32 to vector<2x256xf32>
    %31 = arith.subf %30, %29 : vector<2x256xf32>
    %c0_4 = arith.constant 0 : index
    %c0_5 = arith.constant 0 : index
    %c0_6 = arith.constant 0 : index
    %32 = vector.load %arg4[%c0_4, %c0_5, %c0_6] : memref<2x2x256xf32, #tpu.memory_space<vmem>>, vector<2x2x256xf32>
    %33 = vector.shape_cast %31 : vector<2x256xf32> to vector<2x1x256xf32>
    %34 = vector.broadcast %33 : vector<2x1x256xf32> to vector<2x2x256xf32>
    %35 = arith.mulf %32, %34 : vector<2x2x256xf32>
    %c0_7 = arith.constant 0 : index
    %c0_8 = arith.constant 0 : index
    %c0_9 = arith.constant 0 : index
    %36 = vector.load %arg5[%c0_7, %c0_8, %c0_9] : memref<2x2x256xf32, #tpu.memory_space<vmem>>, vector<2x2x256xf32>
    tpu.vector_store %arg5[%c0_7, %c0_8, %c0_9], %35 {strides = array<i32>} : memref<2x2x256xf32, #tpu.memory_space<vmem>>, vector<2x2x256xf32>,
    return
  }
  func.func @transform_0(%arg0: i32, %arg1: i32) -> (i32, i32, i32) {
    %c0_i32 = arith.constant 0 : i32
    %c0_i32_0 = arith.constant 0 : i32
    %c0_i32_1 = arith.constant 0 : i32
    return %arg0, %c0_i32, %c0_i32_0 : i32, i32, i32
  }
  func.func @transform_1(%arg0: i32, %arg1: i32) -> (i32, i32) {
    %c0_i32 = arith.constant 0 : i32
    %c0_i32_0 = arith.constant 0 : i32
    return %c0_i32, %arg1 : i32, i32
  }
  func.func @transform_2(%arg0: i32, %arg1: i32) -> (i32, i32, i32) {
    %c0_i32 = arith.constant 0 : i32
    %c0_i32_0 = arith.constant 0 : i32
    return %arg0, %c0_i32, %arg1 : i32, i32, i32
  }
  func.func @transform_3(%arg0: i32, %arg1: i32) -> (i32, i32, i32) {
    %c0_i32 = arith.constant 0 : i32
    %c0_i32_0 = arith.constant 0 : i32
    return %arg0, %c0_i32, %arg1 : i32, i32, i32
  }
}

</mosaic_0001>

<bundles_post_ra>
// kernel: tpu_custom_call.1
= control target key start
LH: loop header
LB: loop body
LE: loop exit
PB: predicated region body
PF: predicated region fallthrough
CT: control target
= control target key end

     0   :  { %8 = vsyncpa [#allocation3], 0  ;;  %s893_s0 = inlined_call_operand.hbm [shape: f32[2,1,8], index: 0, kind: input, shape index: {}]   ;;  %s894_s1 = inlined_call_operand.hbm [shape: f32[4,256], index: 1, kind: input, shape index: {}]   ;;  %s895_s2 = inlined_call_operand.hbm [shape: f32[2,2,256], index: 2, kind: input, shape index: {}]   ;;  %s896_s3 = inlined_call_operand.hbm [shape: f32[2,2,256], index: 3, kind: output, shape index: {}]  }
   0x1   :  { %9 = vsyncpa [#allocation6], 0  ;;  %s29_s14 = sshll.u32 %s894_s1, 4  ;;  %s30_s14 = int_to_ptr.hbm [resolvable:$true] %s29_s14 }
   0x2   :  { %10 = vsyncpa [#allocation4], 0  ;;  %s676_s15 = smov [#allocation5]   ;;  %s15_s19 = sshll.u32 %s893_s0, 4  ;;  %s16_s19 = int_to_ptr.hbm [resolvable:$true] %s15_s19 }
   0x3   :  { %s31_s16 = sshll.u32 %s676_s15, 4  ;;  %s677_s20 = smov [#allocation2]   ;;  %s32_s16 = int_to_ptr.vmem [resolvable:$true] %s31_s16 }
   0x4   :  { %34 = dma.hbm_to_vmem [thread:$0]  %s30_s14, 128, %s32_s16, [#allocation6]  }
   0x5   :  { %s17_s21 = sshll.u32 %s677_s20, 4  ;;  %s678_s22 = smov 16   ;;  %s18_s21 = int_to_ptr.vmem [resolvable:$true] %s17_s21 }
   0x6   :  { %s679_s23 = smov 1   ;;  %s39_s1 = sshll.u32 %s895_s2, 4  ;;  %s40_s1 = int_to_ptr.hbm [resolvable:$true] %s39_s1 }
   0x7   :  { %23 = dma.hbm_to_vmem [thread:$0]  %s16_s19, 32, %s18_s21, [#allocation3], %s678_s22, %s678_s22, %s679_s23  }
   0x8   :  { %s680_s26 = smov [#allocation7]   ;;  %s681_s28 = smov 64  }
   0x9   :  { %s41_s27 = sshll.u32 %s680_s26, 4  ;;  %s682_s29 = smov 4   ;;  %s42_s27 = int_to_ptr.vmem [resolvable:$true] %s41_s27 }
   0xa   :  { %47 = dma.hbm_to_vmem [thread:$0]  %s40_s1, 128, %s42_s27, [#allocation6], %s681_s28, %s681_s28, %s682_s29  }
   0xb   :  { %670 = dma.done.wait [#allocation3], 32  }
   0xc   :  { %671 = vsyncadd [#allocation3], 4294967264 }
   0xd   :  { %672 = dma.done.wait [#allocation6], 256  }
   0xe   :  { %673 = vsyncadd [#allocation6], 4294967040  ;;  %v683_v0 = vmov 1   ;;  %v684_v1 = vmov 0   ;;  %v685_v2 = vmov 2   ;;  %v686_v5 = vmov 3  }
   0xf   :  { %567 = vset.pattern.permute.xlu1 %v683_v0  ;;  %566 = vset.pattern.permute.xlu0 %v684_v1  ;;  %v61_v3 = vld [vmem:[#allocation2] sm:$0x1]  ;;  %v62_v4 = vld [vmem:[#allocation2 + $0x1] sm:$0x1]  ;;  %v687_v6 = vmov 4   ;;  %v60_v7 = vld [vmem:[#allocation5] sm:$0xff] }
  0x10   :  { %568 = vset.pattern.permute.xlu2 %v685_v2  ;;  %95 = vperm.xlu1 %567, %v61_v3   ;;  %v105_v8 = vperm.slane %v60_v7, 4  ;;  %v77_v9 = vperm.slane %v60_v7, 6  ;;  %v133_v11 = vperm.slane %v60_v7, 5  ;;  %v104_v14 = vperm.slane %v60_v7, 0  ;;  %s694_s0 = smov [#allocation8]   ;;  %s527_s5 = sshll.u32 %s896_s3, 4  ;;  %s528_s5 = int_to_ptr.hbm [resolvable:$true] %s527_s5 }
  0x11   :  { %65 = vperm.xlu0 %566, %v61_v3   ;;  %123 = vperm.xlu2 %568, %v61_v3   ;;  %v76_v16 = vperm.slane %v60_v7, 2  ;;  %v132_v18 = vperm.slane %v60_v7, 1  ;;  %vm87_vm0 = vcmask 1041409   ;;  %v161_v20 = vperm.slane %v60_v7, 7  ;;  %s525_s2 = sshll.u32 %s694_s0, 4  ;;  %s526_s2 = int_to_ptr.vmem [resolvable:$true] %s525_s2 }
  0x12   :  { %v109_v15 = vperm.slane %v105_v8, 0  ;;  %v81_v17 = vperm.slane %v77_v9, 2  ;;  %v137_v19 = vperm.slane %v133_v11, 1  ;;  %v108_v21 = vperm.slane %v104_v14, 0 }
  0x13   :  { %v80_v23 = vperm.slane %v76_v16, 2  ;;  %vm85_vm1 = vcmask 1040384   ;;  %v136_v25 = vperm.slane %v132_v18, 1  ;;  %v160_v33 = vperm.slane %v60_v7, 3 }
  0x14   :  { %v112_v22 = vrot.slane %v109_v15, 7  ;;  %v84_v24 = vrot.slane %v81_v17, 7  ;;  %v140_v26 = vrot.slane %v137_v19, 7  ;;  %v165_v34 = vperm.slane %v161_v20, 3 }
  0x15   :  { %v164_v43 = vperm.slane %v160_v33, 3 }
  0x16   :  { %v114_v27 = vsel %vm87_vm0, %v108_v21, %v112_v22  ;;  %v113_v35 = vsel %vm85_vm1, %v108_v21, %v112_v22  ;;  %v86_v36 = vsel %vm85_vm1, %v80_v23, %v84_v24  ;;  %v88_v37 = vsel %vm87_vm0, %v80_v23, %v84_v24 }
  0x17   :  { %v141_v39 = vsel %vm85_vm1, %v136_v25, %v140_v26  ;;  %v115_v40 = vrot.slane %v114_v27, 1  ;;  %v168_v44 = vrot.slane %v165_v34, 7  ;;  %v89_v47 = vrot.slane %v88_v37, 1 }
  0x18   :  { %100 = vperm.xlu1 %567, %v62_v4   ;;  %v142_v48 = vsel %vm87_vm0, %v136_v25, %v140_v26  ;;  %v689_v34 = vmov 2475754826  }
  0x19   :  { %71 = vperm.xlu0 %566, %v62_v4   ;;  %128 = vperm.xlu2 %568, %v62_v4   ;;  %v143_v51 = vrot.slane %v142_v48, 1  ;;  %v170_v52 = vsel %vm87_vm0, %v164_v43, %v168_v44  ;;  %v169_v59 = vsel %vm85_vm1, %v164_v43, %v168_v44  ;;  %v692_v43 = vmov 920167782  }
  0x1a   :  { %v171_v62 = vrot.slane %v170_v52, 1 }
  0x20   :  { %570 = vset.pattern.permute.xlu1 %v686_v5 }
  0x21   :  { %569 = vset.pattern.permute.xlu0 %v686_v5  ;;  %156 = vperm.xlu1 %570, %v62_v4  }
  0x22   :  { %151 = vperm.xlu0 %569, %v61_v3   ;;  %571 = vset.pattern.permute.xlu2 %v687_v6 }
  0x23   :  { %179 = vperm.xlu2 %571, %v61_v3  }
  0x29   :  { %572 = vset.pattern.permute.xlu1 %v687_v6 }
  0x2a   :  { %573 = vset.pattern.permute.xlu0 %v687_v6  ;;  %184 = vperm.xlu1 %572, %v62_v4  }
  0x6b   :  { %v124_v10 = vpop.permute.xlu2 %123 }
  0x6c   :  { %v126_v38 = vperm.slane %v124_v10, 0 }
  0x6e   :  { %v146_v50 = vmul.f32 %v141_v39, %v126_v38  ;;  %v691_v38 = vmov 2102212464  }
  0x73   :  { %v129_v28 = vpop.permute.xlu2 %128 }
  0x74   :  { %v131_v56 = vperm.slane %v129_v28, 0 }
  0x76   :  { %v147_v4 = vmul.f32 %v143_v51, %v131_v56 }
  0x7d   :  { %v180_v53 = vpop.permute.xlu2 %179 }
  0x7e   :  { %v182_v2 = vperm.slane %v180_v53, 0 }
  0x82   :  { %v96_v12 = vpop.permute.xlu1 %95 }
  0x83   :  { %v66_v13 = vpop.permute.xlu0 %65  ;;  %v98_v29 = vperm.slane %v96_v12, 0 }
  0x84   :  { %v68_v30 = vperm.slane %v66_v13, 0 }
  0x85   :  { %v118_v41 = vmul.f32 %v113_v35, %v98_v29 }
  0x86   :  { %v92_v42 = vmul.f32 %v86_v36, %v68_v30  ;;  %v690_v36 = vmov 2131351028  }
  0x88   :  { %v120_v49 = vadd.f32 %v118_v41, %v92_v42 }
  0x8a   :  { %v101_v31 = vpop.permute.xlu1 %100  ;;  %v148_v63 = vadd.f32 %v146_v50, %v120_v49 }
  0x8b   :  { %v72_v32 = vpop.permute.xlu0 %71  ;;  %v103_v45 = vperm.slane %v101_v31, 0 }
  0x8c   :  { %v74_v46 = vperm.slane %v72_v32, 0  ;;  %v688_v32 = vmov 683565275  }
  0x8d   :  { %v119_v54 = vmul.f32 %v115_v40, %v103_v45 }
  0x8e   :  { %v93_v55 = vmul.f32 %v89_v47, %v74_v46  ;;  %v693_v47 = vmov 1326507024  }
  0x90   :  { %v121_v3 = vadd.f32 %v119_v54, %v93_v55 }
  0x92   :  { %v149_v8 = vadd.f32 %v147_v4, %v121_v3 }
  0x93   :  { %v157_v57 = vpop.permute.xlu1 %156 }
  0x94   :  { %v152_v58 = vpop.permute.xlu0 %151  ;;  %v159_v61 = vperm.slane %v157_v57, 0 }
  0x95   :  { %v154_v60 = vperm.slane %v152_v58, 0 }
  0x96   :  { %v175_v6 = vmul.f32 %v171_v62, %v159_v61 }
  0x97   :  { %v174_v0 = vmul.f32 %v169_v59, %v154_v60 }
  0x98   :  { %v177_v12 = vadd.f32 %v175_v6, %v149_v8 }
  0x99   :  { %v176_v5 = vadd.f32 %v174_v0, %v148_v63 }
  0x9b   :  { %v736_v7 = vadd.f32 %v182_v2, %v176_v5 }
  0x9c   :  { %v185_v11 = vpop.permute.xlu1 %184 }
  0x9d   :  { %v190_v9 = vand.u32 2147483647, %v736_v7  ;;  %v193_v10 = vand.u32 2139095040, %v736_v7  ;;  %v187_v13 = vperm.slane %v185_v11, 0 }
  0x9f   :  { %v194_v14 = vshrl.u32 %v193_v10, 23  ;;  %v740_v15 = vadd.f32 %v187_v13, %v177_v12  ;;  %v197_v17 = vand.u32 8388607, %v190_v9 }
  0xa1   :  { %v541_v16 = vadd.s32 4294967169, %v194_v14  ;;  %v345_v18 = vand.u32 2147483647, %v740_v15  ;;  %v348_v19 = vand.u32 2139095040, %v740_v15  ;;  %v198_v22 = vor.u32 8388608, %v197_v17 }
  0xa3   :  { %v200_v20 = vadd.s32 1, %v541_v16  ;;  %v349_v21 = vshrl.u32 %v348_v19, 23  ;;  %v352_v23 = vand.u32 8388607, %v345_v18  ;;  %v748_v29 = vshll.u32 %v198_v22, 8 }
  0xa5   :  { %vm201_vm2 = vcmp.gt.s32.totalorder %v200_v20, 0  ;;  %v544_v25 = vadd.s32 4294967169, %v349_v21  ;;  %v353_v30 = vor.u32 8388608, %v352_v23  ;;  %v239_v4 = vand.u32 65535, %v748_v29 }
  0xa6   :  { %v202_v24 = vsel %vm201_vm2, %v200_v20, 0  ;;  %v240_v5 = vshrl.u32 %v748_v29, 16 }
  0xa7   :  { %v204_v26 = vand.u32 31, %v202_v24  ;;  %v203_v27 = vshrl.u32 %v202_v24, 5  ;;  %v355_v31 = vadd.s32 1, %v544_v25  ;;  %v770_v14 = vshll.u32 %v353_v30, 8 }
  0xa9   :  { %v205_v28 = vsub.s32 32, %v204_v26  ;;  %v207_v33 = vshll.u32 %v688_v32, %v204_v26  ;;  %v210_v35 = vshll.u32 %v689_v34, %v204_v26  ;;  %v213_v37 = vshll.u32 %v690_v36, %v204_v26 }
  0xaa   :  { %v216_v39 = vshll.u32 %v691_v38, %v204_v26  ;;  %v219_v44 = vshll.u32 %v692_v43, %v204_v26  ;;  %vm222_vm3 = vcmp.lt.s32.totalorder %v203_v27, 1  ;;  %vm356_vm4 = vcmp.gt.s32.totalorder %v355_v31, 0 }
  0xab   :  { %v208_v40 = vshrl.u32 %v689_v34, %v205_v28  ;;  %v211_v41 = vshrl.u32 %v690_v36, %v205_v28  ;;  %v214_v42 = vshrl.u32 %v691_v38, %v205_v28  ;;  %v206_v45 = vshrl.u32 %v688_v32, %v205_v28 }
  0xac   :  { %v217_v46 = vshrl.u32 %v692_v43, %v205_v28  ;;  %v220_v48 = vshrl.u32 %v693_v47, %v205_v28  ;;  %vm225_vm5 = vcmp.lt.s32.totalorder %v203_v27, 4  ;;  %v357_v54 = vsel %vm356_vm4, %v355_v31, 0 }
  0xad   :  { %v209_v49 = vor.u32 %v208_v40, %v207_v33  ;;  %v212_v50 = vor.u32 %v211_v41, %v210_v35  ;;  %v215_v51 = vor.u32 %v214_v42, %v213_v37  ;;  %vm223_vm6 = vcmp.lt.s32.totalorder %v203_v27, 2 }
  0xae   :  { %v218_v52 = vor.u32 %v217_v46, %v216_v39  ;;  %v221_v53 = vor.u32 %v220_v48, %v219_v44  ;;  %vm224_vm7 = vcmp.lt.s32.totalorder %v203_v27, 3  ;;  %v359_v0 = vand.u32 31, %v357_v54 }
  0xaf   :  { %v227_v55 = vsel %vm225_vm5, %v215_v51, 2102212464  ;;  %v230_v56 = vsel %vm222_vm3, %v209_v49, %v212_v50  ;;  %v234_v57 = vsel %vm222_vm3, %v212_v50, %v215_v51  ;;  %v226_v58 = vsel %vm222_vm3, %v206_v45, %v209_v49 }
  0xb0   :  { %v231_v59 = vsel %vm225_vm5, %v218_v52, 920167782  ;;  %v235_v60 = vsel %vm225_vm5, %v221_v53, 1326507024  ;;  %v228_v61 = vsel %vm224_vm7, %v212_v50, %v227_v55  ;;  %v768_v13 = vshrl.u32 %v357_v54, 5 }
  0xb1   :  { %v232_v62 = vsel %vm224_vm7, %v215_v51, %v231_v59  ;;  %v236_v63 = vsel %vm224_vm7, %v218_v52, %v235_v60  ;;  %v766_v12 = vsel %vm223_vm6, %v226_v58, %v228_v61  ;;  %v772_v19 = vsub.s32 32, %v359_v0 }
  0xb2   :  { %v233_v2 = vsel %vm223_vm6, %v230_v56, %v232_v62  ;;  %v237_v3 = vsel %vm223_vm6, %v234_v57, %v236_v63  ;;  %v362_v20 = vshll.u32 %v688_v32, %v359_v0  ;;  %v365_v23 = vshll.u32 %v689_v34, %v359_v0 }
  0xb3   :  { %v241_v6 = vand.u32 65535, %v237_v3  ;;  %v242_v8 = vshrl.u32 %v237_v3, 16  ;;  %v263_v10 = vand.u32 65535, %v233_v2  ;;  %v264_v11 = vshrl.u32 %v233_v2, 16 }
  0xb4   :  { %v368_v24 = vshll.u32 %v690_v36, %v359_v0  ;;  %v363_v40 = vshrl.u32 %v689_v34, %v772_v19  ;;  %v366_v44 = vshrl.u32 %v690_v36, %v772_v19  ;;  %v369_v54 = vshrl.u32 %v691_v38, %v772_v19 }
  0xb5   :  { %v244_v16 = vmul.u32 %v242_v8, %v239_v4  ;;  %v245_v17 = vmul.u32 %v241_v6, %v240_v5  ;;  %v266_v21 = vmul.u32 %v264_v11, %v239_v4  ;;  %v267_v22 = vmul.u32 %v263_v10, %v240_v5 }
  0xb6   :  { %v243_v25 = vmul.u32 %v241_v6, %v239_v4  ;;  %v246_v26 = vmul.u32 %v242_v8, %v240_v5  ;;  %v265_v28 = vmul.u32 %v263_v10, %v239_v4  ;;  %v268_v30 = vmul.u32 %v264_v11, %v240_v5 }
  0xb7   :  { %v247_v27 = vshll.u32 %v244_v16, 16  ;;  %v248_v31 = vshrl.u32 %v244_v16, 16  ;;  %v249_v33 = vshll.u32 %v245_v17, 16  ;;  %v269_v35 = vshll.u32 %v266_v21, 16 }
  0xb8   :  { %v271_v39 = vshll.u32 %v267_v22, 16  ;;  %v250_v45 = vshrl.u32 %v245_v17, 16  ;;  %v270_v50 = vshrl.u32 %v266_v21, 16  ;;  %v785_v53 = vor.u32 %v363_v40, %v362_v20 }
  0xb9   :  { %vm251_vm8 = vc.u32 %v243_v25, %v247_v27  ;;  %v253_v37 = vadd.s32 %v247_v27, %v243_v25  ;;  %vm273_vm9 = vc.u32 %v265_v28, %v269_v35  ;;  %v275_v42 = vadd.s32 %v269_v35, %v265_v28 }
  0xba   :  { %v252_v41 = vsel %vm251_vm8, 1, %v684_v1  ;;  %v274_v48 = vsel %vm273_vm9, 1, %v684_v1  ;;  %v789_v36 = vor.u32 %v366_v44, %v365_v23  ;;  %v371_v56 = vshll.u32 %v691_v38, %v359_v0 }
  0xbb   :  { %v254_v46 = vadd.s32 %v252_v41, %v246_v26  ;;  %vm255_vm10 = vc.u32 %v253_v37, %v249_v33  ;;  %v276_v51 = vadd.s32 %v274_v48, %v268_v30  ;;  %vm277_vm11 = vc.u32 %v275_v42, %v271_v39 }
  0xbc   :  { %v256_v49 = vsel %vm255_vm10, 1, %v684_v1  ;;  %v278_v34 = vsel %vm277_vm11, 1, %v684_v1  ;;  %v372_v57 = vshrl.u32 %v692_v43, %v772_v19  ;;  %v370_v59 = vor.u32 %v369_v54, %v368_v24 }
  0xbd   :  { %v258_v52 = vadd.s32 %v256_v49, %v254_v46  ;;  %v280_v55 = vadd.s32 %v278_v34, %v276_v51  ;;  %v374_v60 = vshll.u32 %v692_v43, %v359_v0  ;;  %v375_v61 = vshrl.u32 %v693_v47, %v772_v19 }
  0xbe   :  { %v272_v62 = vshrl.u32 %v267_v22, 16  ;;  %v373_v2 = vor.u32 %v372_v57, %v371_v56  ;;  %vm377_vm12 = vcmp.lt.s32.totalorder %v768_v13, 1  ;;  %v800_v4 = vadd.s32 %v275_v42, %v271_v39 }
  0xbf   :  { %v259_v58 = vadd.s32 %v258_v52, %v248_v31  ;;  %v281_v63 = vadd.s32 %v280_v55, %v270_v50  ;;  %v376_v38 = vor.u32 %v375_v61, %v374_v60  ;;  %vm380_vm13 = vcmp.lt.s32.totalorder %v768_v13, 4 }
  0xc0   :  { %vm379_vm14 = vcmp.lt.s32.totalorder %v768_v13, 3  ;;  %v385_v43 = vsel %vm377_vm12, %v785_v53, %v789_v36  ;;  %v386_v47 = vsel %vm380_vm13, %v373_v2, 920167782  ;;  %vm378_vm0 = vcmp.lt.s32.totalorder %v768_v13, 2 }
  0xc1   :  { %v798_v3 = vadd.s32 %v259_v58, %v250_v45  ;;  %v282_v5 = vadd.s32 %v281_v63, %v272_v62  ;;  %v387_v0 = vsel %vm379_vm14, %v370_v59, %v386_v47  ;;  %v389_v10 = vsel %vm377_vm12, %v789_v36, %v370_v59 }
  0xc2   :  { %v388_v8 = vsel %vm378_vm0, %v385_v43, %v387_v0  ;;  %v390_v11 = vsel %vm380_vm13, %v376_v38, 1326507024  ;;  %v283_v16 = vmul.u32 %v748_v29, %v766_v12  ;;  %v394_v24 = vand.u32 65535, %v770_v14 }
  0xc3   :  { %vm285_vm15 = vc.u32 %v798_v3, %v800_v4  ;;  %v286_v6 = vadd.s32 1, %v282_v5  ;;  %v391_v17 = vsel %vm379_vm14, %v373_v2, %v390_v11  ;;  %v418_v20 = vand.u32 65535, %v388_v8 }
  0xc4   :  { %v419_v21 = vshrl.u32 %v388_v8, 16  ;;  %v392_v23 = vsel %vm378_vm0, %v389_v10, %v391_v17  ;;  %v395_v25 = vshrl.u32 %v770_v14, 16  ;;  %v361_v54 = vshrl.u32 %v688_v32, %v772_v19 }
  0xc5   :  { %v287_v22 = vsel %vm285_vm15, %v286_v6, %v282_v5  ;;  %v396_v27 = vand.u32 65535, %v392_v23  ;;  %v397_v28 = vshrl.u32 %v392_v23, 16  ;;  %v420_v35 = vmul.u32 %v418_v20, %v394_v24 }
  0xc6   :  { %v288_v26 = vadd.s32 %v287_v22, %v283_v16  ;;  %v421_v31 = vmul.u32 %v419_v21, %v394_v24  ;;  %v422_v33 = vmul.u32 %v418_v20, %v395_v25  ;;  %v423_v51 = vmul.u32 %v419_v21, %v395_v25 }
  0xc7   :  { %v399_v29 = vmul.u32 %v397_v28, %v394_v24  ;;  %v400_v12 = vmul.u32 %v396_v27, %v395_v25  ;;  %v398_v40 = vmul.u32 %v396_v27, %v394_v24  ;;  %v401_v42 = vmul.u32 %v397_v28, %v395_v25 }
  0xc8   :  { %v289_v30 = vadd.s32 536870912, %v288_v26  ;;  %v424_v37 = vshll.u32 %v421_v31, 16  ;;  %v426_v44 = vshll.u32 %v422_v33, 16  ;;  %v382_v56 = vsel %vm380_vm13, %v370_v59, 2102212464 }
  0xc9   :  { %v402_v41 = vshll.u32 %v399_v29, 16  ;;  %v404_v48 = vshll.u32 %v400_v12, 16  ;;  %v403_v62 = vshrl.u32 %v399_v29, 16  ;;  %v381_v2 = vsel %vm377_vm12, %v361_v54, %v785_v53 }
  0xca   :  { %v830_v39 = vshrl.u32 %v289_v30, 30  ;;  %vm428_vm1 = vc.u32 %v420_v35, %v424_v37  ;;  %v430_v45 = vadd.s32 %v424_v37, %v420_v35  ;;  %v425_v38 = vshrl.u32 %v421_v31, 16 }
  0xcb   :  { %vm406_vm2 = vc.u32 %v398_v40, %v402_v41  ;;  %v408_v49 = vadd.s32 %v402_v41, %v398_v40  ;;  %v429_v52 = vsel %vm428_vm1, 1, %v684_v1  ;;  %v383_v59 = vsel %vm379_vm14, %v789_v36, %v382_v56 }
  0xcc   :  { %v291_v46 = vshll.u32 %v830_v39, 30  ;;  %v407_v50 = vsel %vm406_vm2, 1, %v684_v1  ;;  %vm432_vm3 = vc.u32 %v430_v45, %v426_v44  ;;  %v431_v58 = vadd.s32 %v429_v52, %v423_v51 }
  0xcd   :  { %v409_v55 = vadd.s32 %v407_v50, %v401_v42  ;;  %vm410_vm4 = vc.u32 %v408_v49, %v404_v48  ;;  %v433_v60 = vsel %vm432_vm3, 1, %v684_v1  ;;  %v405_v5 = vshrl.u32 %v400_v12, 16 }
  0xce   :  { %v292_v34 = vsub.s32 %v288_v26, %v291_v46  ;;  %v411_v57 = vsel %vm410_vm4, 1, %v684_v1  ;;  %v435_v32 = vadd.s32 %v433_v60, %v431_v58  ;;  %v427_v0 = vshrl.u32 %v422_v33, 16 }
  0xcf   :  { %v413_v63 = vadd.s32 %v411_v57, %v409_v55  ;;  %v434_v8 = vadd.s32 %v430_v45, %v426_v44  ;;  %v384_v11 = vsel %vm378_vm0, %v381_v2, %v383_v59  ;;  %v284_v36 = vadd.s32 %v800_v4, %v798_v3 }
  0xd0   :  { %vm293_vm5 = vcmp.lt.s32.totalorder %v292_v34, 0  ;;  %v294_v61 = vsub.s32 0, %v292_v34  ;;  %v436_v1 = vadd.s32 %v435_v32, %v425_v38  ;;  %v438_v20 = vmul.u32 %v770_v14, %v384_v11 }
  0xd1   :  { %v414_v43 = vadd.s32 %v413_v63, %v403_v62  ;;  %vm192_vm9 = vcmp.lt.s32.totalorder %v736_v7, 0  ;;  %vm858_vm10 = vcmp.le.f32.partialorder %v190_v9, 0.7853982  ;;  %v314_v45 = vsub.s32 4, %v830_v39 }
  0xd2   :  { %v295_v19 = vsel %vm293_vm5, %v294_v61, %v292_v34  ;;  %v437_v16 = vadd.s32 %v436_v1, %v427_v0  ;;  %vm347_vm15 = vcmp.lt.s32.totalorder %v740_v15, 0  ;;  %vm333_vm0 = vweird.f32 %v736_v7 }
  0xd3   :  { %v296_v47 = vclz %v295_v19  ;;  %v415_v6 = vadd.s32 %v414_v43, %v405_v5  ;;  %v315_v52 = vsel %vm192_vm9, %v314_v45, %v830_v39  ;;  %vm873_vm1 = vcmp.le.f32.partialorder %v345_v18, 0.7853982 }
  0xd4   :  { %v441_v53 = vadd.s32 1, %v437_v16  ;;  %v317_v58 = vsel %vm858_vm10, 0, %v315_v52  ;;  %vm512_vm2 = vcmask 1041408  }
  0xd5   :  { %v542_v10 = vadd.s32 4294967294, %v296_v47  ;;  %vm440_vm6 = vc.u32 %v415_v6, %v434_v8  ;;  %v439_v55 = vadd.s32 %v434_v8, %v415_v6  ;;  %v334_v19 = vadd.s32 3, %v317_v58 }
  0xd6   :  { %v442_v23 = vsel %vm440_vm6, %v441_v53, %v437_v16  ;;  %vm488_vm6 = vweird.f32 %v740_v15 }
  0xd7   :  { %vm543_vm7 = vcmp.lt.s32.totalorder %v542_v10, 0  ;;  %v443_v24 = vadd.s32 %v442_v23, %v438_v20  ;;  %v335_v6 = vand.u32 3, %v334_v19 }
  0xd8   :  { %v299_v17 = vsel %vm543_vm7, 0, %v542_v10 }
  0xd9   :  { %v300_v21 = vsub.s32 32, %v299_v17  ;;  %v304_v22 = vsub.s32 4294967266, %v299_v17  ;;  %v301_v25 = vshll.u32 %v292_v34, %v299_v17  ;;  %v444_v28 = vadd.s32 536870912, %v443_v24 }
  0xda   :  { %vm337_vm12 = vcmp.eq.s32.totalorder %v335_v6, 0  ;;  %vm340_vm13 = vcmp.eq.s32.totalorder %v335_v6, 2  ;;  %vm336_vm14 = vcmp.lt.s32.totalorder %v335_v6, 2 }
  0xdb   :  { %v302_v26 = vshrl.u32 %v284_v36, %v300_v21  ;;  %v305_v27 = vadd.s32 127, %v304_v22  ;;  %v852_v33 = vshrl.u32 %v444_v28, 30 }
  0xdd   :  { %v303_v13 = vor.u32 %v302_v26, %v301_v25  ;;  %v306_v31 = vshll.u32 %v305_v27, 23  ;;  %v446_v29 = vshll.u32 %v852_v33, 30  ;;  %v469_v26 = vsub.s32 4, %v852_v33 }
  0xdf   :  { %v307_v30 = vor.u32 4788187, %v306_v31  ;;  %v310_v14 = vcvt.s32.f32 %v303_v13  ;;  %v447_v35 = vsub.s32 %v443_v24, %v446_v29  ;;  %v470_v29 = vsel %vm347_vm15, %v469_v26, %v852_v33 }
  0xe1   :  { %v308_v12 = vand.u32 2147483647, %v307_v30  ;;  %vm448_vm8 = vcmp.lt.s32.totalorder %v447_v35, 0  ;;  %v449_v3 = vsub.s32 0, %v447_v35 }
  0xe3   :  { %v311_v37 = vmul.f32 %v310_v14, %v308_v12  ;;  %v450_v40 = vsel %vm448_vm8, %v449_v3, %v447_v35  ;;  %v502_v12 = vld [vmem:[#allocation7] sm:$0xf]  ;;  %v472_v3 = vsel %vm873_vm1, 0, %v470_v29 }
  0xe4   :  { %v451_v44 = vclz %v450_v40 }
  0xe5   :  { %v312_v4 = vxor.u32 2147483648, %v311_v37 }
  0xe6   :  { %v545_v49 = vadd.s32 4294967294, %v451_v44 }
  0xe7   :  { %v313_v42 = vsel %vm192_vm9, %v312_v4, %v311_v37 }
  0xe8   :  { %v316_v46 = vsel %vm858_vm10, %v736_v7, %v313_v42  ;;  %vm546_vm11 = vcmp.lt.s32.totalorder %v545_v49, 0 }
  0xe9   :  { %v318_v48 = vmul.f32 %v316_v46, %v316_v46  ;;  %v454_v34 = vsel %vm546_vm11, 0, %v545_v49 }
  0xea   :  { %v455_v56 = vsub.s32 32, %v454_v34  ;;  %v459_v57 = vsub.s32 4294967266, %v454_v34  ;;  %v456_v63 = vshll.u32 %v447_v35, %v454_v34 }
  0xeb   :  { %v319_v50 = vmul.f32 -0.001358992, %v318_v48  ;;  %v326_v51 = vmul.f32 -0.00019511016, %v318_v48 }
  0xec   :  { %v457_v62 = vshrl.u32 %v439_v55, %v455_v56  ;;  %v460_v2 = vadd.s32 127, %v459_v57 }
  0xed   :  { %v320_v9 = vadd.f32 0.041655596, %v319_v50  ;;  %v327_v54 = vadd.f32 0.008332121, %v326_v51 }
  0xee   :  { %v458_v59 = vor.u32 %v457_v62, %v456_v63  ;;  %v461_v5 = vshll.u32 %v460_v2, 23 }
  0xef   :  { %v321_v60 = vmul.f32 %v320_v9, %v318_v48  ;;  %v328_v61 = vmul.f32 %v327_v54, %v318_v48 }
  0xf0   :  { %v462_v47 = vor.u32 4788187, %v461_v5  ;;  %v465_v10 = vcvt.s32.f32 %v458_v59 }
  0xf1   :  { %v322_v38 = vadd.f32 -0.4999988, %v321_v60  ;;  %v329_v32 = vadd.f32 -0.16666654, %v328_v61  ;;  %v503_v61 = vld [vmem:[#allocation7 + $0x4] sm:$0xf] }
  0xf2   :  { %v463_v8 = vand.u32 2147483647, %v462_v47 }
  0xf3   :  { %v323_v39 = vmul.f32 %v322_v38, %v318_v48  ;;  %v330_v43 = vmul.f32 %v329_v32, %v318_v48 }
  0xf4   :  { %v466_v53 = vmul.f32 %v465_v10, %v463_v8 }
  0xf5   :  { %v324_v0 = vadd.f32 1.0, %v323_v39  ;;  %v331_v1 = vadd.f32 1.0, %v330_v43 }
  0xf6   :  { %v467_v20 = vxor.u32 2147483648, %v466_v53 }
  0xf7   :  { %v332_v11 = vmul.f32 %v331_v1, %v316_v46  ;;  %v341_v16 = vxor.u32 2147483648, %v324_v0  ;;  %v489_v46 = vadd.s32 3, %v472_v3 }
  0xf8   :  { %v468_v24 = vsel %vm347_vm15, %v467_v20, %v466_v53 }
  0xf9   :  { %v338_v17 = vxor.u32 2147483648, %v332_v11  ;;  %v342_v21 = vsel %vm340_vm13, %v341_v16, %v332_v11  ;;  %v471_v27 = vsel %vm873_vm1, %v740_v15, %v468_v24  ;;  %v490_v51 = vand.u32 3, %v489_v46 }
  0xfa   :  { %v473_v28 = vmul.f32 %v471_v27, %v471_v27 }
  0xfb   :  { %v339_v36 = vsel %vm337_vm12, %v324_v0, %v338_v17  ;;  %vm492_vm3 = vcmp.eq.s32.totalorder %v490_v51, 0  ;;  %vm495_vm4 = vcmp.eq.s32.totalorder %v490_v51, 2  ;;  %vm491_vm5 = vcmp.lt.s32.totalorder %v490_v51, 2 }
  0xfc   :  { %v343_v22 = vsel %vm336_vm14, %v339_v36, %v342_v21  ;;  %v474_v31 = vmul.f32 -0.001358992, %v473_v28  ;;  %v481_v30 = vmul.f32 -0.00019511016, %v473_v28 }
  0xfd   :  { %v344_v25 = vsel %vm333_vm0, nan, %v343_v22 }
  0xfe   :  { %v500_v13 = vsub.f32 0.0, %v344_v25  ;;  %v475_v18 = vadd.f32 0.041655596, %v474_v31  ;;  %v482_v14 = vadd.f32 0.008332121, %v481_v30 }
 0x100   :  { %v507_v7 = vperm.slane %v500_v13, 1  ;;  %v506_v35 = vperm.slane %v500_v13, 0  ;;  %v476_v4 = vmul.f32 %v475_v18, %v473_v28  ;;  %v483_v40 = vmul.f32 %v482_v14, %v473_v28 }
 0x102   :  { %v510_v37 = vrot.slane %v507_v7, 6  ;;  %v477_v44 = vadd.f32 -0.4999988, %v476_v4  ;;  %v484_v45 = vadd.f32 -0.16666654, %v483_v40 }
 0x104   :  { %v513_v41 = vsel %vm512_vm2, %v506_v35, %v510_v37  ;;  %v478_v48 = vmul.f32 %v477_v44, %v473_v28  ;;  %v485_v33 = vmul.f32 %v484_v45, %v473_v28 }
 0x105   :  { %v517_v42 = vmul.f32 %v513_v41, %v502_v12 }
 0x106   :  { %v479_v49 = vadd.f32 1.0, %v478_v48  ;;  %v486_v50 = vadd.f32 1.0, %v485_v33 }
 0x107   :  { %519 = vst [vmem:[#allocation8] sm:$0xf] %v517_v42 }
 0x108   :  { %v487_v52 = vmul.f32 %v486_v50, %v471_v27  ;;  %v496_v34 = vxor.u32 2147483648, %v479_v49 }
 0x10a   :  { %v493_v9 = vxor.u32 2147483648, %v487_v52  ;;  %v497_v55 = vsel %vm495_vm4, %v496_v34, %v487_v52 }
 0x10c   :  { %v494_v54 = vsel %vm492_vm3, %v479_v49, %v493_v9 }
 0x10d   :  { %v498_v56 = vsel %vm491_vm5, %v494_v54, %v497_v55 }
 0x10e   :  { %v499_v57 = vsel %vm488_vm6, nan, %v498_v56 }
 0x10f   :  { %v501_v58 = vsub.f32 0.0, %v499_v57 }
 0x111   :  { %v509_v60 = vperm.slane %v501_v58, 1  ;;  %v508_v62 = vperm.slane %v501_v58, 0 }
 0x113   :  { %v511_v63 = vrot.slane %v509_v60, 6 }
 0x115   :  { %v514_v2 = vsel %vm512_vm2, %v508_v62, %v511_v63 }
 0x116   :  { %v518_v38 = vmul.f32 %v514_v2, %v503_v61 }
 0x118   :  { %520 = vst [vmem:[#allocation8 + $0x4] sm:$0xf] %v518_v38 }
 0x119   :  { %533 = dma.vmem_to_hbm [thread:$0]  %s526_s2, 128, %s528_s5, [#allocation4], %s681_s28, %s681_s28, %s682_s29  }
 0x11a   :  { %674 = dma.done.wait [#allocation4], 128  }
 0x11b   :  { %675 = vsyncadd [#allocation4], 4294967168 }
 0x11c   :  { %538 = vsyncpa [#allocation3], 1 }
 0x11d   :  { %539 = vsyncpa [#allocation6], 1 }
 0x11e   :  { %540 = vsyncpa [#allocation4], 1 }

</bundles_post_ra>
